<compile_context>
chip_gen: v6e
topology: v6e:2x2x1
jax: 0.10.0
libtpu: 0.0.40
codegen_flags: <defaults>
</compile_context>

<pallas_src>
import functools

import jax
import jax.numpy as jnp
from jax.experimental import pallas as pl
from jax.experimental.pallas import tpu as pltpu


# ---------------------------------------------------------------------------
# Kernels
# ---------------------------------------------------------------------------

def _ffn_resident_kernel(x_ref, w1_ref, b1_ref, w2_ref, b2_ref, o_ref,
                         *, n_sub, sub_h):
    """Whole FFN for one (TM, E) row tile; W1/W2 fully VMEM-resident.

    Grid = (num M tiles,).  The constant index_maps on the weight BlockSpecs
    mean their blocks never change -> Pallas DMAs them once and reuses them
    for every M tile.  The hidden dim is split into `n_sub` static sub-chunks
    so the layer-2 matmul of sub-chunk k can overlap the layer-1 matmul +
    bias/ReLU/cast epilogue of sub-chunk k+1 (MXU vs VPU slots).
    """
    x = x_ref[...].astype(w1_ref.dtype)        # cast in-kernel: no extra HBM pass
    acc = None
    for k in range(n_sub):                     # static unroll
        hs = pl.ds(k * sub_h, sub_h)
        h = jnp.dot(x, w1_ref[:, hs], preferred_element_type=jnp.float32)
        h = jnp.maximum(h + b1_ref[:, hs].astype(jnp.float32), 0.0)
        p = jnp.dot(h.astype(w2_ref.dtype), w2_ref[hs, :],
                    preferred_element_type=jnp.float32)
        acc = p if acc is None else acc + p
    acc = acc + b2_ref[...].astype(jnp.float32)
    o_ref[...] = acc.astype(o_ref.dtype)


def _ffn_chunked_kernel(x_ref, w1_ref, b1_ref, w2_ref, b2_ref, o_ref,
                        *maybe_acc):
    """Fallback for large E: grid = (M tiles, H chunks); weights streamed.

    Layer-2 partials are accumulated across the H ("arbitrary", last) axis,
    either into an f32 VMEM scratch or -- when the output dtype is already
    f32 -- directly into the resident output block (no scratch, no copy).
    """
    j = pl.program_id(1)
    acc_ref = maybe_acc[0] if maybe_acc else o_ref

    @pl.when(j == 0)
    def _():
        # Fold the layer-2 bias into the accumulator init.
        acc_ref[...] = jnp.broadcast_to(
            b2_ref[...].astype(jnp.float32), acc_ref.shape)

    x = x_ref[...].astype(w1_ref.dtype)
    h = jnp.dot(x, w1_ref[...], preferred_element_type=jnp.float32)
    h = jnp.maximum(h + b1_ref[...].astype(jnp.float32), 0.0)
    acc_ref[...] += jnp.dot(h.astype(w2_ref.dtype), w2_ref[...],
                            preferred_element_type=jnp.float32)

    if maybe_acc:                              # only needed when acc != o_ref
        @pl.when(j == pl.num_programs(1) - 1)
        def _():
            o_ref[...] = acc_ref[...].astype(o_ref.dtype)


# ---------------------------------------------------------------------------
# Wrapper
# ---------------------------------------------------------------------------

def _round_up(x, m):
    return (x + m - 1) // m * m


def _vmem_capacity_bytes():
    """Per-TensorCore VMEM capacity (generation-aware), with a safe fallback."""
    try:
        info = pltpu.get_tpu_info()
        cap = getattr(info, "vmem_capacity_bytes", None)
        if cap:
            return int(cap)
    except Exception:
        pass
    return 64 * 1024 * 1024        # conservative floor (v7x per-TensorCore)


@functools.partial(jax.jit, static_argnames=("block_m",))
def feed_forward(x, w1, b1, w2, b2, *, block_m=512):
    """FeedForward: Linear(E->4E) -> ReLU -> Linear(4E->E).

    x:  (B, T, E), any float dtype (left un-cast in HBM; cast per-tile on-chip)
    w1: (E, H), b1: (H,), w2: (H, E), b2: (E,)   with H = 4*E.
    The weight dtype selects the MXU compute precision: pass bf16 weights
    (converted once, outside this jitted call) for the fast path, f32 for an
    exact-precision path.
    """
    B, T, E = x.shape
    H = w1.shape[1]
    M = B * T
    out_dtype = x.dtype

    x_size = jnp.dtype(x.dtype).itemsize
    w_size = jnp.dtype(w1.dtype).itemsize
    b_size = jnp.dtype(b1.dtype).itemsize
    o_size = jnp.dtype(out_dtype).itemsize

    # ---- generation-aware VMEM budget -------------------------------------
    vmem_cap = _vmem_capacity_bytes()            # 64 MiB (v7x) / 128 MiB (v5e/v6e)
    vmem_limit = int(0.85 * vmem_cap)
    tile_budget = int(0.70 * vmem_limit)         # headroom for Mosaic scratch/spills

    # ---- M tiling: multiples of 16 (bf16 sublane packing); guarantee >= 2
    #      tiles on the "parallel" axis when there is enough work (v7x has
    #      2 TensorCores; costs one extra grid step on 1-TC parts) -----------
    tm = max(16, _round_up(min(block_m, M), 16))
    if M >= 64:
        tm = min(tm, max(16, _round_up(-(-M // 2), 16)))

    def resident_bytes(tm_):
        # Pallas allocates 2 buffers per BlockSpec (count x2 even for the
        # resident weights to stay conservative).
        return (2 * tm_ * E * x_size
                + 2 * E * H * w_size + 2 * H * E * w_size
                + 2 * (H + E) * b_size
                + 2 * tm_ * E * o_size)

    def chunked_bytes(tm_, th, with_acc):
        return (2 * tm_ * E * x_size
                + 2 * E * th * w_size + 2 * th * E * w_size
                + 2 * (th + E) * b_size
                + 2 * tm_ * E * o_size
                + (tm_ * E * 4 if with_acc else 0))

    # Prefer full weight residency (weights DMA'd exactly once); shrink TM
    # before giving residency up.
    resident = resident_bytes(tm) <= tile_budget
    if not resident:
        t = tm
        while t > 64 and resident_bytes(t) > tile_budget:
            t = max(16, _round_up(t // 2, 16))
        if resident_bytes(t) <= tile_budget:
            tm, resident = t, True

    M_pad = _round_up(M, tm)
    num_m = M_pad // tm

    # ---- operand prep (no dtype casts in the wrapper) ----------------------
    x2d = x.reshape(M, E)
    if M_pad != M:
        x2d = jnp.pad(x2d, ((0, M_pad - M), (0, 0)))
    b1_2d = b1.reshape(1, H)
    b2_2d = b2.reshape(1, E)

    if resident:
        # Split H into 2 static sub-chunks (when cleanly possible) to overlap
        # layer-2 MXU work with the layer-1 epilogue of the next sub-chunk.
        n_sub = 2 if (H % 256 == 0 and H >= 512) else 1
        kernel = functools.partial(
            _ffn_resident_kernel, n_sub=n_sub, sub_h=H // n_sub)
        grid_spec = pltpu.PrefetchScalarGridSpec(
            num_scalar_prefetch=0,
            grid=(num_m,),
            in_specs=[
                pl.BlockSpec((tm, E), lambda i: (i, 0)),   # x tile
                pl.BlockSpec((E, H), lambda i: (0, 0)),    # W1 (resident, 1 DMA)
                pl.BlockSpec((1, H), lambda i: (0, 0)),    # b1
                pl.BlockSpec((H, E), lambda i: (0, 0)),    # W2 (resident, 1 DMA)
                pl.BlockSpec((1, E), lambda i: (0, 0)),    # b2
            ],
            out_specs=pl.BlockSpec((tm, E), lambda i: (i, 0)),
            scratch_shapes=[],
        )
        dim_sem = ("parallel",)
        weight_reads = 1
        num_h = 1
    else:
        # Weights do not fit: stream (E,TH)/(TH,E) chunks along a trailing
        # reduction axis.  TH = largest 128-multiple divisor of H that fits.
        with_acc = jnp.dtype(out_dtype) != jnp.dtype(jnp.float32)
        th = None
        if H % 128 == 0:
            c = H
            while c >= 128:
                if H % c == 0 and chunked_bytes(tm, c, with_acc) <= tile_budget:
                    th = c
                    break
                c -= 128
        if th is None:
            # TODO(synk): odd H that still overflows VMEM would need H padding.
            th = H
        num_h = H // th
        kernel = _ffn_chunked_kernel
        grid_spec = pltpu.PrefetchScalarGridSpec(
            num_scalar_prefetch=0,
            grid=(num_m, num_h),
            in_specs=[
                pl.BlockSpec((tm, E), lambda i, j: (i, 0)),   # x tile
                pl.BlockSpec((E, th), lambda i, j: (0, j)),   # W1 chunk
                pl.BlockSpec((1, th), lambda i, j: (0, j)),   # b1 chunk
                pl.BlockSpec((th, E), lambda i, j: (j, 0)),   # W2 chunk
                pl.BlockSpec((1, E),  lambda i, j: (0, 0)),   # b2
            ],
            out_specs=pl.BlockSpec((tm, E), lambda i, j: (i, 0)),
            scratch_shapes=(
                [pltpu.VMEM((tm, E), jnp.float32)] if with_acc else []),
        )
        dim_sem = ("parallel", "arbitrary")
        weight_reads = num_m                  # streamed once per M tile

    flops = 2 * M_pad * E * H * 2             # two matmuls
    bytes_accessed = (M_pad * E * x_size
                      + weight_reads * 2 * E * H * w_size
                      + (H + E) * b_size
                      + M_pad * E * o_size)

    out2d = pl.pallas_call(
        kernel,
        out_shape=jax.ShapeDtypeStruct((M_pad, E), out_dtype),
        grid_spec=grid_spec,
        compiler_params=pltpu.CompilerParams(
            dimension_semantics=dim_sem,
            vmem_limit_bytes=vmem_limit,
        ),
        cost_estimate=pl.CostEstimate(
            flops=flops, transcendentals=0, bytes_accessed=bytes_accessed),
    )(x2d, w1, b1_2d, w2, b2_2d)

    if M_pad != M:
        out2d = out2d[:M]
    return out2d.reshape(B, T, E)


# ---------------------------------------------------------------------------
# Reference / test
# ---------------------------------------------------------------------------

def _init_params(key, embed_size, dtype=jnp.float32):
    """Deterministic init mirroring nn.Linear's uniform(-1/sqrt(fan_in), +)."""
    hidden = 4 * embed_size
    k1, k2, k3, k4 = jax.random.split(key, 4)
    lim1 = 1.0 / (embed_size ** 0.5)
    lim2 = 1.0 / (hidden ** 0.5)
    # Stored as (in, out) so the kernel does x @ W (PyTorch stores (out, in)).
    w1 = jax.random.uniform(k1, (embed_size, hidden), dtype, -lim1, lim1)
    b1 = jax.random.uniform(k2, (hidden,), dtype, -lim1, lim1)
    w2 = jax.random.uniform(k3, (hidden, embed_size), dtype, -lim2, lim2)
    b2 = jax.random.uniform(k4, (embed_size,), dtype, -lim2, lim2)
    return w1, b1, w2, b2


def _reference(x, w1, b1, w2, b2):
    """Pure-JAX reference matching the kernel's precision path (weight dtype
    selects the matmul dtype, biases added in f32, f32 accumulation)."""
    xc = x.reshape(-1, x.shape[-1]).astype(w1.dtype)
    h = jnp.dot(xc, w1, preferred_element_type=jnp.float32) \
        + b1.astype(jnp.float32)
    h = jnp.maximum(h, 0.0)
    y = jnp.dot(h.astype(w2.dtype), w2, preferred_element_type=jnp.float32) \
        + b2.astype(jnp.float32)
    return y.reshape(x.shape).astype(x.dtype)


if __name__ == "__main__":
    B, T, E = 2, 8, 128                  # embed multiple of 128; hidden = 512
    key = jax.random.PRNGKey(0)
    kx, kp = jax.random.split(key)

    x = jax.random.normal(kx, (B, T, E), jnp.float32)
    w1, b1, w2, b2 = _init_params(kp, E)

    # Exact path: f32 weights -> f32 MXU compute, tight tolerance.
    y32 = jax.block_until_ready(feed_forward(x, w1, b1, w2, b2))
    y_ref32 = _reference(x, w1, b1, w2, b2)
    assert y32.shape == (B, T, E)
    assert jnp.allclose(y32, y_ref32, atol=2e-4, rtol=2e-4), "f32 mismatch"

    # Fast path: weights pre-converted to bf16 ONCE outside the jitted call
    # (x stays f32 in HBM and is cast per-tile inside the kernel).
    w1b = w1.astype(jnp.bfloat16)
    w2b = w2.astype(jnp.bfloat16)
    ybf = jax.block_until_ready(feed_forward(x, w1b, b1, w2b, b2))
    y_refbf = _reference(x, w1b, b1, w2b, b2)
    assert ybf.shape == (B, T, E)
    assert jnp.allclose(ybf, y_refbf, atol=2e-2, rtol=2e-2), "bf16 mismatch"

    print("KERNEL_OK")
</pallas_src>

<mosaic_0001>
module attributes {stable_mosaic.version = 11 : i64} {
  func.func @_ffn_resident_kernel(%arg0: i32, %arg1: memref<16x128xf32, #tpu.memory_space<vmem>>, %arg2: memref<128x512xf32, #tpu.memory_space<vmem>>, %arg3: memref<1x512xf32, #tpu.memory_space<vmem>>, %arg4: memref<512x128xf32, #tpu.memory_space<vmem>>, %arg5: memref<1x128xf32, #tpu.memory_space<vmem>>, %arg6: memref<16x128xf32, #tpu.memory_space<vmem>>) attributes {dimension_semantics = [#tpu.dimension_semantics<parallel>], iteration_bounds = array<i64: 1>, scalar_prefetch = 0 : i64, scratch_operands = 0 : i64, tpu.core_type = #tpu.core_type<tc>, window_params = [{transform_indices = @transform_0, window_bounds = array<i64: 16, 128>}, {pipeline_mode = #tpu.pipeline_mode<synchronous>, transform_indices = @transform_1, window_bounds = array<i64: 128, 512>}, {pipeline_mode = #tpu.pipeline_mode<synchronous>, transform_indices = @transform_2, window_bounds = array<i64: 1, 512>}, {pipeline_mode = #tpu.pipeline_mode<synchronous>, transform_indices = @transform_3, window_bounds = array<i64: 512, 128>}, {pipeline_mode = #tpu.pipeline_mode<synchronous>, transform_indices = @transform_4, window_bounds = array<i64: 1, 128>}, {transform_indices = @transform_5, window_bounds = array<i64: 16, 128>}]} {
    %c0 = arith.constant 0 : index
    %c0_0 = arith.constant 0 : index
    %0 = vector.load %arg1[%c0, %c0_0] : memref<16x128xf32, #tpu.memory_space<vmem>>, vector<16x128xf32>
    %c0_1 = arith.constant 0 : index
    %c0_2 = arith.constant 0 : index
    %1 = vector.load %arg2[%c0_1, %c0_2] : memref<128x512xf32, #tpu.memory_space<vmem>>, vector<128x256xf32>
    %cst = arith.constant dense<0.000000e+00> : vector<16x256xf32>
    %2 = tpu.matmul %0, %1, %cst {dimension_numbers = #tpu.dot_dimension_numbers<[1], [0], [0], [1], [0, 0, 1, 1], [], []>} : vector<16x128xf32>, vector<128x256xf32>, vector<16x256xf32> -> vector<16x256xf32>
    %c0_3 = arith.constant 0 : index
    %c0_4 = arith.constant 0 : index
    %3 = vector.load %arg3[%c0_3, %c0_4] : memref<1x512xf32, #tpu.memory_space<vmem>>, vector<1x256xf32>
    %4 = vector.broadcast %3 : vector<1x256xf32> to vector<16x256xf32>
    %5 = arith.addf %2, %4 : vector<16x256xf32>
    %cst_5 = arith.constant 0.000000e+00 : f32
    %6 = vector.broadcast %cst_5 : f32 to vector<16x256xf32>
    %7 = arith.maximumf %5, %6 : vector<16x256xf32>
    %c0_6 = arith.constant 0 : index
    %c0_7 = arith.constant 0 : index
    %8 = vector.load %arg4[%c0_6, %c0_7] : memref<512x128xf32, #tpu.memory_space<vmem>>, vector<256x128xf32>
    %cst_8 = arith.constant dense<0.000000e+00> : vector<16x128xf32>
    %9 = tpu.matmul %7, %8, %cst_8 {dimension_numbers = #tpu.dot_dimension_numbers<[1], [0], [0], [1], [0, 0, 1, 1], [], []>} : vector<16x256xf32>, vector<256x128xf32>, vector<16x128xf32> -> vector<16x128xf32>
    %c0_9 = arith.constant 0 : index
    %c256 = arith.constant 256 : index
    %10 = vector.load %arg2[%c0_9, %c256] : memref<128x512xf32, #tpu.memory_space<vmem>>, vector<128x256xf32>
    %cst_10 = arith.constant dense<0.000000e+00> : vector<16x256xf32>
    %11 = tpu.matmul %0, %10, %cst_10 {dimension_numbers = #tpu.dot_dimension_numbers<[1], [0], [0], [1], [0, 0, 1, 1], [], []>} : vector<16x128xf32>, vector<128x256xf32>, vector<16x256xf32> -> vector<16x256xf32>
    %c0_11 = arith.constant 0 : index
    %c256_12 = arith.constant 256 : index
    %12 = vector.load %arg3[%c0_11, %c256_12] : memref<1x512xf32, #tpu.memory_space<vmem>>, vector<1x256xf32>
    %13 = vector.broadcast %12 : vector<1x256xf32> to vector<16x256xf32>
    %14 = arith.addf %11, %13 : vector<16x256xf32>
    %cst_13 = arith.constant 0.000000e+00 : f32
    %15 = vector.broadcast %cst_13 : f32 to vector<16x256xf32>
    %16 = arith.maximumf %14, %15 : vector<16x256xf32>
    %c256_14 = arith.constant 256 : index
    %c0_15 = arith.constant 0 : index
    %17 = vector.load %arg4[%c256_14, %c0_15] : memref<512x128xf32, #tpu.memory_space<vmem>>, vector<256x128xf32>
    %cst_16 = arith.constant dense<0.000000e+00> : vector<16x128xf32>
    %18 = tpu.matmul %16, %17, %cst_16 {dimension_numbers = #tpu.dot_dimension_numbers<[1], [0], [0], [1], [0, 0, 1, 1], [], []>} : vector<16x256xf32>, vector<256x128xf32>, vector<16x128xf32> -> vector<16x128xf32>
    %19 = arith.addf %9, %18 : vector<16x128xf32>
    %c0_17 = arith.constant 0 : index
    %c0_18 = arith.constant 0 : index
    %20 = vector.load %arg5[%c0_17, %c0_18] : memref<1x128xf32, #tpu.memory_space<vmem>>, vector<1x128xf32>
    %21 = vector.broadcast %20 : vector<1x128xf32> to vector<16x128xf32>
    %22 = arith.addf %19, %21 : vector<16x128xf32>
    %c0_19 = arith.constant 0 : index
    %c0_20 = arith.constant 0 : index
    %23 = vector.load %arg6[%c0_19, %c0_20] : memref<16x128xf32, #tpu.memory_space<vmem>>, vector<16x128xf32>
    tpu.vector_store %arg6[%c0_19, %c0_20], %22 {strides = array<i32>} : memref<16x128xf32, #tpu.memory_space<vmem>>, vector<16x128xf32>,
    return
  }
  func.func @transform_0(%arg0: i32) -> (i32, i32) {
    %c0_i32 = arith.constant 0 : i32
    %c0_i32_0 = arith.constant 0 : i32
    return %arg0, %c0_i32 : i32, i32
  }
  func.func @transform_1(%arg0: i32) -> (i32, i32) {
    %c0_i32 = arith.constant 0 : i32
    %c0_i32_0 = arith.constant 0 : i32
    %c0_i32_1 = arith.constant 0 : i32
    return %c0_i32, %c0_i32_0 : i32, i32
  }
  func.func @transform_2(%arg0: i32) -> (i32, i32) {
    %c0_i32 = arith.constant 0 : i32
    %c0_i32_0 = arith.constant 0 : i32
    %c0_i32_1 = arith.constant 0 : i32
    return %c0_i32, %c0_i32_0 : i32, i32
  }
  func.func @transform_3(%arg0: i32) -> (i32, i32) {
    %c0_i32 = arith.constant 0 : i32
    %c0_i32_0 = arith.constant 0 : i32
    %c0_i32_1 = arith.constant 0 : i32
    return %c0_i32, %c0_i32_0 : i32, i32
  }
  func.func @transform_4(%arg0: i32) -> (i32, i32) {
    %c0_i32 = arith.constant 0 : i32
    %c0_i32_0 = arith.constant 0 : i32
    %c0_i32_1 = arith.constant 0 : i32
    return %c0_i32, %c0_i32_0 : i32, i32
  }
  func.func @transform_5(%arg0: i32) -> (i32, i32) {
    %c0_i32 = arith.constant 0 : i32
    %c0_i32_0 = arith.constant 0 : i32
    return %arg0, %c0_i32 : i32, i32
  }
}

</mosaic_0001>

<bundles_post_ra>
// kernel: feed_forward.1
= control target key start
LH: loop header
LB: loop body
LE: loop exit
PB: predicated region body
PF: predicated region fallthrough
CT: control target
= control target key end

     0   :  { %10 = vsyncpa [#allocation3], 0  ;;  %s802_s0 = inlined_call_operand.hbm [shape: f32[16,128], index: 0, kind: input, shape index: {}]   ;;  %s803_s1 = inlined_call_operand.hbm [shape: f32[128,512], index: 1, kind: input, shape index: {}]   ;;  %s804_s2 = inlined_call_operand.vmem [shape: f32[1,512], index: 2, kind: input, shape index: {}]   ;;  %s805_s3 = inlined_call_operand.hbm [shape: f32[512,128], index: 3, kind: input, shape index: {}]   ;;  %s806_s4 = inlined_call_operand.vmem [shape: f32[1,128], index: 4, kind: input, shape index: {}]   ;;  %s807_s5 = inlined_call_operand.hbm [shape: f32[16,128], index: 5, kind: output, shape index: {}]  }
   0x1   :  { %11 = vsyncpa [#allocation6], 0 }
   0x2   :  { %12 = vsyncpa [#allocation4], 0  ;;  %s729_s18 = smov [#allocation5]  }
   0x3   :  { %s30_s19 = sshll.u32 %s729_s18, 4  ;;  %s31_s19 = int_to_ptr.vmem [resolvable:$true] %s30_s19 }
   0x4   :  { %s651_s20 = scalar_lea.vmem %s31_s19, 8192  ;;  %p656_p1 = scmp.lt.s32.totalorder %s31_s19, %s31_s19 }
   0x5   :  { %p652_p0 = scmp.ne.s32.totalorder %s31_s19, %s651_s20  ;;  %p657_p2 = scmp.lt.s32.totalorder %s651_s20, %s651_s20 }
   0x7   :  { %p658_p3 = por %p657_p2, %p656_p1 }
   0x9   :  { %p659_p4 = pnand %p658_p3, %p652_p0 }
   0xb   :  { %662 = shalt.err (!%p659_p4)
}
   0xc   :  { %s730_s21 = smov 512   ;;  %s731_s22 = smov 32  }
   0xd   :  { %36 = dma.hbm_to_vmem [thread:$0]  %s803_s1, 8192, %s31_s19, [#allocation6], %s730_s21, %s730_s21, %s731_s22  }
   0xe   :  { %s732_s25 = smov [#allocation2]  }
   0xf   :  { %s18_s26 = sshll.u32 %s732_s25, 4  ;;  %s19_s26 = int_to_ptr.vmem [resolvable:$true] %s18_s26 }
  0x10   :  { %s671_s27 = scalar_lea.vmem %s19_s26, 256  ;;  %p676_p6 = scmp.lt.s32.totalorder %s19_s26, %s19_s26 }
  0x11   :  { %p672_p5 = scmp.ne.s32.totalorder %s19_s26, %s671_s27  ;;  %p677_p7 = scmp.lt.s32.totalorder %s671_s27, %s671_s27 }
  0x13   :  { %p678_p8 = por %p677_p7, %p676_p6 }
  0x15   :  { %p679_p9 = pnand %p678_p8, %p672_p5 }
  0x17   :  { %682 = shalt.err (!%p679_p9)
}
  0x18   :  { %s733_s28 = smov 128   ;;  %s734_s29 = smov 8  }
  0x19   :  { %24 = dma.hbm_to_vmem [thread:$0]  %s802_s0, 256, %s19_s26, [#allocation3], %s733_s28, %s733_s28, %s734_s29  }
  0x1a   :  { %s735_s1 = smov [#allocation7]  }
  0x1b   :  { %s44_s7 = sshll.u32 %s735_s1, 4  ;;  %s45_s7 = int_to_ptr.vmem [resolvable:$true] %s44_s7 }
  0x1c   :  { %s691_s8 = scalar_lea.vmem %s45_s7, 8192  ;;  %p696_p11 = scmp.lt.s32.totalorder %s45_s7, %s45_s7 }
  0x1d   :  { %p692_p10 = scmp.ne.s32.totalorder %s45_s7, %s691_s8  ;;  %p697_p12 = scmp.lt.s32.totalorder %s691_s8, %s691_s8 }
  0x1f   :  { %p698_p13 = por %p697_p12, %p696_p11 }
  0x21   :  { %p699_p0 = pnand %p698_p13, %p692_p10 }
  0x23   :  { %702 = shalt.err (!%p699_p0)
}
  0x24   :  { %50 = dma.hbm_to_vmem [thread:$0]  %s805_s3, 8192, %s45_s7, [#allocation6], %s733_s28, %s733_s28, %s734_s29  }
  0x25   :  { %723 = dma.done.wait [#allocation3], 256  }
  0x26   :  { %724 = vsyncadd [#allocation3], 4294967040 }
  0x27   :  { %725 = dma.done.wait [#allocation6], 16384  }
  0x28   :  { %726 = vsyncadd [#allocation6], 4294950912  ;;  %v736_v0 = vmov 0.0   ;;  %v95_v1 = vld [vmem:[#allocation5 + $0x1e8] sm:$0xff]  ;;  %v252_v2 = vld [vmem:[#allocation5 + $0x1f8] sm:$0xff]  ;;  %s737_s14 = smov [#allocation8]  }
  0x29   :  { %172 = vmatprep.mubr.f32.mxu0 %v736_v0  ;;  %329 = vmatprep.mubr.f32.mxu1 %v736_v0  ;;  %v94_v3 = vld [vmem:[#allocation5 + $0x1e0] sm:$0xff]  ;;  %v251_v4 = vld [vmem:[#allocation5 + $0x1f0] sm:$0xff]  ;;  %v93_v5 = vld [vmem:[#allocation5 + $0x1c8] sm:$0xff]  ;;  %s544_s15 = sshll.u32 %s737_s14, 4  ;;  %s545_s15 = int_to_ptr.vmem [resolvable:$true] %s544_s15 }
  0x2a   :  { %108 = vmatprep.subr.mxu0 %v95_v1  ;;  %265 = vmatprep.subr.mxu1 %v252_v2  ;;  %v250_v6 = vld [vmem:[#allocation5 + $0x1d8] sm:$0xff]  ;;  %v92_v7 = vld [vmem:[#allocation5 + $0x1c0] sm:$0xff]  ;;  %v249_v8 = vld [vmem:[#allocation5 + $0x1d0] sm:$0xff]  ;;  %s703_s16 = scalar_lea.vmem %s545_s15, 256  ;;  %p708_p2 = scmp.lt.s32.totalorder %s545_s15, %s545_s15 }
  0x2b   :  { %109 = vmatpush1.msra.mxu0 %v94_v3  ;;  %266 = vmatpush1.msra.mxu1 %v251_v4  ;;  %v91_v9 = vld [vmem:[#allocation5 + $0x1a8] sm:$0xff]  ;;  %v248_v10 = vld [vmem:[#allocation5 + $0x1b8] sm:$0xff]  ;;  %v90_v11 = vld [vmem:[#allocation5 + $0x1a0] sm:$0xff]  ;;  %p704_p1 = scmp.ne.s32.totalorder %s545_s15, %s703_s16  ;;  %p709_p3 = scmp.lt.s32.totalorder %s703_s16, %s703_s16 }
  0x2c   :  { %110 = vmatprep.subr.mxu0 %v93_v5  ;;  %267 = vmatprep.subr.mxu1 %v250_v6  ;;  %v247_v12 = vld [vmem:[#allocation5 + $0x1b0] sm:$0xff]  ;;  %v89_v13 = vld [vmem:[#allocation5 + $0x188] sm:$0xff]  ;;  %v246_v14 = vld [vmem:[#allocation5 + $0x198] sm:$0xff] }
  0x2d   :  { %111 = vmatpush1.msra.mxu0 %v92_v7  ;;  %268 = vmatpush1.msra.mxu1 %v249_v8  ;;  %v88_v15 = vld [vmem:[#allocation5 + $0x180] sm:$0xff]  ;;  %v245_v16 = vld [vmem:[#allocation5 + $0x190] sm:$0xff]  ;;  %v87_v17 = vld [vmem:[#allocation5 + $0x168] sm:$0xff]  ;;  %p710_p4 = por %p709_p3, %p708_p2 }
  0x2e   :  { %112 = vmatprep.subr.mxu0 %v91_v9  ;;  %269 = vmatprep.subr.mxu1 %v248_v10  ;;  %v244_v18 = vld [vmem:[#allocation5 + $0x178] sm:$0xff]  ;;  %v86_v19 = vld [vmem:[#allocation5 + $0x160] sm:$0xff]  ;;  %v243_v20 = vld [vmem:[#allocation5 + $0x170] sm:$0xff] }
  0x2f   :  { %113 = vmatpush1.msra.mxu0 %v90_v11  ;;  %270 = vmatpush1.msra.mxu1 %v247_v12  ;;  %v85_v21 = vld [vmem:[#allocation5 + $0x148] sm:$0xff]  ;;  %v242_v22 = vld [vmem:[#allocation5 + $0x158] sm:$0xff]  ;;  %v84_v23 = vld [vmem:[#allocation5 + $0x140] sm:$0xff]  ;;  %p711_p5 = pnand %p710_p4, %p704_p1 }
  0x30   :  { %114 = vmatprep.subr.mxu0 %v89_v13  ;;  %271 = vmatprep.subr.mxu1 %v246_v14  ;;  %v241_v24 = vld [vmem:[#allocation5 + $0x150] sm:$0xff]  ;;  %v83_v25 = vld [vmem:[#allocation5 + $0x128] sm:$0xff]  ;;  %v240_v26 = vld [vmem:[#allocation5 + $0x138] sm:$0xff] }
  0x31   :  { %115 = vmatpush1.msra.mxu0 %v88_v15  ;;  %272 = vmatpush1.msra.mxu1 %v245_v16  ;;  %v82_v27 = vld [vmem:[#allocation5 + $0x120] sm:$0xff]  ;;  %v239_v28 = vld [vmem:[#allocation5 + $0x130] sm:$0xff]  ;;  %v81_v29 = vld [vmem:[#allocation5 + $0x108] sm:$0xff] }
  0x32   :  { %116 = vmatprep.subr.mxu0 %v87_v17  ;;  %273 = vmatprep.subr.mxu1 %v244_v18  ;;  %v238_v30 = vld [vmem:[#allocation5 + $0x118] sm:$0xff]  ;;  %v80_v31 = vld [vmem:[#allocation5 + $0x100] sm:$0xff]  ;;  %v237_v32 = vld [vmem:[#allocation5 + $0x110] sm:$0xff] }
  0x33   :  { %117 = vmatpush1.msra.mxu0 %v86_v19  ;;  %274 = vmatpush1.msra.mxu1 %v243_v20  ;;  %v79_v33 = vld [vmem:[#allocation5 + $0xe8] sm:$0xff]  ;;  %v236_v34 = vld [vmem:[#allocation5 + $0xf8] sm:$0xff]  ;;  %v78_v35 = vld [vmem:[#allocation5 + $0xe0] sm:$0xff] }
  0x34   :  { %118 = vmatprep.subr.mxu0 %v85_v21  ;;  %275 = vmatprep.subr.mxu1 %v242_v22  ;;  %v235_v36 = vld [vmem:[#allocation5 + $0xf0] sm:$0xff]  ;;  %v77_v37 = vld [vmem:[#allocation5 + $0xc8] sm:$0xff]  ;;  %v234_v38 = vld [vmem:[#allocation5 + $0xd8] sm:$0xff] }
  0x35   :  { %119 = vmatpush1.msra.mxu0 %v84_v23  ;;  %276 = vmatpush1.msra.mxu1 %v241_v24  ;;  %v76_v39 = vld [vmem:[#allocation5 + $0xc0] sm:$0xff]  ;;  %v233_v40 = vld [vmem:[#allocation5 + $0xd0] sm:$0xff]  ;;  %v75_v41 = vld [vmem:[#allocation5 + $0xa8] sm:$0xff] }
  0x36   :  { %120 = vmatprep.subr.mxu0 %v83_v25  ;;  %277 = vmatprep.subr.mxu1 %v240_v26  ;;  %v232_v42 = vld [vmem:[#allocation5 + $0xb8] sm:$0xff]  ;;  %v74_v43 = vld [vmem:[#allocation5 + $0xa0] sm:$0xff]  ;;  %v231_v44 = vld [vmem:[#allocation5 + $0xb0] sm:$0xff] }
  0x37   :  { %121 = vmatpush1.msra.mxu0 %v82_v27  ;;  %278 = vmatpush1.msra.mxu1 %v239_v28  ;;  %v73_v45 = vld [vmem:[#allocation5 + $0x88] sm:$0xff]  ;;  %v230_v46 = vld [vmem:[#allocation5 + $0x98] sm:$0xff]  ;;  %v72_v47 = vld [vmem:[#allocation5 + $0x80] sm:$0xff] }
  0x38   :  { %122 = vmatprep.subr.mxu0 %v81_v29  ;;  %279 = vmatprep.subr.mxu1 %v238_v30  ;;  %v229_v48 = vld [vmem:[#allocation5 + $0x90] sm:$0xff]  ;;  %v71_v49 = vld [vmem:[#allocation5 + $0x68] sm:$0xff]  ;;  %v228_v50 = vld [vmem:[#allocation5 + $0x78] sm:$0xff] }
  0x39   :  { %123 = vmatpush1.msra.mxu0 %v80_v31  ;;  %280 = vmatpush1.msra.mxu1 %v237_v32  ;;  %v70_v51 = vld [vmem:[#allocation5 + $0x60] sm:$0xff]  ;;  %v227_v52 = vld [vmem:[#allocation5 + $0x70] sm:$0xff]  ;;  %v69_v53 = vld [vmem:[#allocation5 + $0x48] sm:$0xff] }
  0x3a   :  { %124 = vmatprep.subr.mxu0 %v79_v33  ;;  %281 = vmatprep.subr.mxu1 %v236_v34  ;;  %v226_v54 = vld [vmem:[#allocation5 + $0x58] sm:$0xff]  ;;  %v68_v55 = vld [vmem:[#allocation5 + $0x40] sm:$0xff]  ;;  %v225_v56 = vld [vmem:[#allocation5 + $0x50] sm:$0xff] }
  0x3b   :  { %125 = vmatpush1.msra.mxu0 %v78_v35  ;;  %282 = vmatpush1.msra.mxu1 %v235_v36  ;;  %v67_v57 = vld [vmem:[#allocation5 + $0x28] sm:$0xff]  ;;  %v224_v58 = vld [vmem:[#allocation5 + $0x38] sm:$0xff]  ;;  %v66_v59 = vld [vmem:[#allocation5 + $0x20] sm:$0xff] }
  0x3c   :  { %126 = vmatprep.subr.mxu0 %v77_v37  ;;  %283 = vmatprep.subr.mxu1 %v234_v38  ;;  %v223_v60 = vld [vmem:[#allocation5 + $0x30] sm:$0xff]  ;;  %v65_v61 = vld [vmem:[#allocation5 + $0x8] sm:$0xff]  ;;  %v222_v62 = vld [vmem:[#allocation5 + $0x18] sm:$0xff] }
  0x3d   :  { %127 = vmatpush1.msra.mxu0 %v76_v39  ;;  %284 = vmatpush1.msra.mxu1 %v233_v40  ;;  %v64_v63 = vld [vmem:[#allocation5] sm:$0xff]  ;;  %v221_v1 = vld [vmem:[#allocation5 + $0x10] sm:$0xff]  ;;  %v377_v3 = vld [vmem:[#allocation7 + $0x1f8] sm:$0xff] }
  0x3e   :  { %128 = vmatprep.subr.mxu0 %v75_v41  ;;  %285 = vmatprep.subr.mxu1 %v232_v42  ;;  %v62_v2 = vld [vmem:[#allocation2] sm:$0xff]  ;;  %v220_v4 = vld [vmem:[#allocation7 + $0xf8] sm:$0xff]  ;;  %v375_v12 = vld [vmem:[#allocation7 + $0x1e8] sm:$0xff] }
  0x3f   :  { %129 = vmatpush1.msra.mxu0 %v74_v43  ;;  %286 = vmatpush1.msra.mxu1 %v231_v44  ;;  %v361_v5 = vld [vmem:[#allocation7 + $0x178] sm:$0xff]  ;;  %v376_v8 = vld [vmem:[#allocation7 + $0x1f0] sm:$0xff]  ;;  %v218_v13 = vld [vmem:[#allocation7 + $0xe8] sm:$0xff] }
  0x40   :  { %130 = vmatprep.subr.mxu0 %v73_v45  ;;  %287 = vmatprep.subr.mxu1 %v230_v46  ;;  %v204_v6 = vld [vmem:[#allocation7 + $0x78] sm:$0xff]  ;;  %v219_v9 = vld [vmem:[#allocation7 + $0xf0] sm:$0xff]  ;;  %v359_v14 = vld [vmem:[#allocation7 + $0x168] sm:$0xff] }
  0x41   :  { %131 = vmatpush1.msra.mxu0 %v72_v47  ;;  %288 = vmatpush1.msra.mxu1 %v229_v48  ;;  %v63_v7 = vld [vmem:[#allocation2 + $0x8] sm:$0xff]  ;;  %v360_v10 = vld [vmem:[#allocation7 + $0x170] sm:$0xff]  ;;  %v202_v15 = vld [vmem:[#allocation7 + $0x68] sm:$0xff] }
  0x42   :  { %132 = vmatprep.subr.mxu0 %v71_v49  ;;  %289 = vmatprep.subr.mxu1 %v228_v50  ;;  %v203_v11 = vld [vmem:[#allocation7 + $0x70] sm:$0xff]  ;;  %v217_v16 = vld [vmem:[#allocation7 + $0xe0] sm:$0xff]  ;;  %v373_v19 = vld [vmem:[#allocation7 + $0x1d8] sm:$0xff] }
  0x43   :  { %133 = vmatpush1.msra.mxu0 %v70_v51  ;;  %290 = vmatpush1.msra.mxu1 %v227_v52  ;;  %v358_v17 = vld [vmem:[#allocation7 + $0x160] sm:$0xff]  ;;  %v216_v20 = vld [vmem:[#allocation7 + $0xd8] sm:$0xff]  ;;  %v372_v23 = vld [vmem:[#allocation7 + $0x1d0] sm:$0xff] }
  0x44   :  { %134 = vmatprep.subr.mxu0 %v69_v53  ;;  %291 = vmatprep.subr.mxu1 %v226_v54  ;;  %v201_v18 = vld [vmem:[#allocation7 + $0x60] sm:$0xff]  ;;  %v357_v21 = vld [vmem:[#allocation7 + $0x158] sm:$0xff]  ;;  %v215_v24 = vld [vmem:[#allocation7 + $0xd0] sm:$0xff] }
  0x45   :  { %135 = vmatpush1.msra.mxu0 %v68_v55  ;;  %292 = vmatpush1.msra.mxu1 %v225_v56  ;;  %v200_v22 = vld [vmem:[#allocation7 + $0x58] sm:$0xff]  ;;  %v356_v25 = vld [vmem:[#allocation7 + $0x150] sm:$0xff]  ;;  %v371_v27 = vld [vmem:[#allocation7 + $0x1c8] sm:$0xff] }
  0x46   :  { %136 = vmatprep.subr.mxu0 %v67_v57  ;;  %293 = vmatprep.subr.mxu1 %v224_v58  ;;  %v199_v26 = vld [vmem:[#allocation7 + $0x50] sm:$0xff]  ;;  %v214_v28 = vld [vmem:[#allocation7 + $0xc8] sm:$0xff]  ;;  %v370_v31 = vld [vmem:[#allocation7 + $0x1c0] sm:$0xff] }
  0x47   :  { %137 = vmatpush1.msra.mxu0 %v66_v59  ;;  %294 = vmatpush1.msra.mxu1 %v223_v60  ;;  %v355_v29 = vld [vmem:[#allocation7 + $0x148] sm:$0xff]  ;;  %v213_v32 = vld [vmem:[#allocation7 + $0xc0] sm:$0xff]  ;;  %v369_v35 = vld [vmem:[#allocation7 + $0x1b8] sm:$0xff] }
  0x48   :  { %138 = vmatprep.subr.mxu0 %v65_v61  ;;  %295 = vmatprep.subr.mxu1 %v222_v62  ;;  %v198_v30 = vld [vmem:[#allocation7 + $0x48] sm:$0xff]  ;;  %v354_v33 = vld [vmem:[#allocation7 + $0x140] sm:$0xff]  ;;  %v212_v36 = vld [vmem:[#allocation7 + $0xb8] sm:$0xff] }
  0x49   :  { %139 = vmatpush1.msra.mxu0 %v64_v63  ;;  %296 = vmatpush1.msra.mxu1 %v221_v1  ;;  %v197_v34 = vld [vmem:[#allocation7 + $0x40] sm:$0xff]  ;;  %v353_v37 = vld [vmem:[#allocation7 + $0x138] sm:$0xff]  ;;  %v368_v39 = vld [vmem:[#allocation7 + $0x1b0] sm:$0xff] }
  0x4a   :  { %173 = vmatmul.mubr.f32.vlgmr.msra.gmra.mxu0 %v62_v2  ;;  %330 = vmatmul.mubr.f32.vlgmr.msra.gmra.mxu1 %v62_v2  ;;  %v196_v38 = vld [vmem:[#allocation7 + $0x38] sm:$0xff]  ;;  %v211_v40 = vld [vmem:[#allocation7 + $0xb0] sm:$0xff]  ;;  %v367_v43 = vld [vmem:[#allocation7 + $0x1a8] sm:$0xff] }
  0x4b   :  { %178 = vmatprep.mubr.f32.mxu0 %v736_v0  ;;  %335 = vmatprep.mubr.f32.mxu1 %v736_v0  ;;  %v374_v0 = vld [vmem:[#allocation7 + $0x1e0] sm:$0xff]  ;;  %v352_v41 = vld [vmem:[#allocation7 + $0x130] sm:$0xff]  ;;  %v210_v44 = vld [vmem:[#allocation7 + $0xa8] sm:$0xff] }
  0x4c   :  { %558 = vmatprep.subr.mxu0 %v377_v3  ;;  %596 = vmatprep.subr.mxu1 %v220_v4  ;;  %v195_v42 = vld [vmem:[#allocation7 + $0x30] sm:$0xff]  ;;  %v351_v45 = vld [vmem:[#allocation7 + $0x128] sm:$0xff]  ;;  %v366_v47 = vld [vmem:[#allocation7 + $0x1a0] sm:$0xff]  ;;  %v98_v4 = vlaneseq }
  0x4d   :  { %559 = vmatpush3.msra.mxu0 %v361_v5  ;;  %597 = vmatpush3.msra.mxu1 %v204_v6  ;;  %v194_v46 = vld [vmem:[#allocation7 + $0x28] sm:$0xff]  ;;  %v209_v48 = vld [vmem:[#allocation7 + $0xa0] sm:$0xff]  ;;  %v365_v51 = vld [vmem:[#allocation7 + $0x198] sm:$0xff] }
  0x4e   :  { %179 = vmatmul.mubr.f32.gmra.mxu0 %v63_v7  ;;  %336 = vmatmul.mubr.f32.gmra.mxu1 %v63_v7  ;;  %v350_v49 = vld [vmem:[#allocation7 + $0x120] sm:$0xff]  ;;  %v208_v52 = vld [vmem:[#allocation7 + $0x98] sm:$0xff]  ;;  %v364_v55 = vld [vmem:[#allocation7 + $0x190] sm:$0xff]  ;;  %v99_v5 = vshrl.u32 %v98_v4, 7 }
  0x4f   :  { %560 = vmatprep.subr.mxu0 %v376_v8  ;;  %598 = vmatprep.subr.mxu1 %v219_v9  ;;  %v193_v50 = vld [vmem:[#allocation7 + $0x20] sm:$0xff]  ;;  %v349_v53 = vld [vmem:[#allocation7 + $0x118] sm:$0xff]  ;;  %v207_v56 = vld [vmem:[#allocation7 + $0x90] sm:$0xff] }
  0x50   :  { %561 = vmatpush3.msra.mxu0 %v360_v10  ;;  %599 = vmatpush3.msra.mxu1 %v203_v11  ;;  %v192_v54 = vld [vmem:[#allocation7 + $0x18] sm:$0xff]  ;;  %v348_v57 = vld [vmem:[#allocation7 + $0x110] sm:$0xff]  ;;  %v363_v59 = vld [vmem:[#allocation7 + $0x188] sm:$0xff]  ;;  %v100_v6 = vsub.s32 0, %v99_v5  ;;  %v104_v9 = vsub.s32 1, %v99_v5 }
  0x51   :  { %562 = vmatprep.subr.mxu0 %v375_v12  ;;  %600 = vmatprep.subr.mxu1 %v218_v13  ;;  %v191_v58 = vld [vmem:[#allocation7 + $0x10] sm:$0xff]  ;;  %v206_v60 = vld [vmem:[#allocation7 + $0x88] sm:$0xff]  ;;  %v362_v63 = vld [vmem:[#allocation7 + $0x180] sm:$0xff] }
  0x52   :  { %563 = vmatpush3.msra.mxu0 %v359_v14  ;;  %601 = vmatpush3.msra.mxu1 %v202_v15  ;;  %v347_v61 = vld [vmem:[#allocation7 + $0x108] sm:$0xff]  ;;  %v205_v1 = vld [vmem:[#allocation7 + $0x80] sm:$0xff]  ;;  %v96_v7 = vld [vmem:[%s804_s2] sm:$0x3] }
  0x53   :  { %564 = vmatprep.subr.mxu0 %v374_v0  ;;  %602 = vmatprep.subr.mxu1 %v217_v16  ;;  %v190_v62 = vld [vmem:[#allocation7 + $0x8] sm:$0xff]  ;;  %v346_v2 = vld [vmem:[#allocation7 + $0x100] sm:$0xff]  ;;  %v253_v8 = vld [vmem:[%s804_s2 + $0x2] sm:$0x3]  ;;  %v101_v10 = vrot.slane %v96_v7, %v100_v6  ;;  %v105_v12 = vrot.slane %v96_v7, %v104_v9 }
  0x54   :  { %565 = vmatpush3.msra.mxu0 %v358_v17  ;;  %603 = vmatpush3.msra.mxu1 %v201_v18  ;;  %v189_v3 = vld [vmem:[#allocation7] sm:$0xff]  ;;  %v258_v11 = vrot.slane %v253_v8, %v100_v6  ;;  %v262_v13 = vrot.slane %v253_v8, %v104_v9 }
  0x55   :  { %566 = vmatprep.subr.mxu0 %v373_v19  ;;  %604 = vmatprep.subr.mxu1 %v216_v20 }
  0x56   :  { %567 = vmatpush3.msra.mxu0 %v357_v21  ;;  %605 = vmatpush3.msra.mxu1 %v200_v22 }
  0x57   :  { %568 = vmatprep.subr.mxu0 %v372_v23  ;;  %606 = vmatprep.subr.mxu1 %v215_v24 }
  0x58   :  { %569 = vmatpush3.msra.mxu0 %v356_v25  ;;  %607 = vmatpush3.msra.mxu1 %v199_v26 }
  0x59   :  { %570 = vmatprep.subr.mxu0 %v371_v27  ;;  %608 = vmatprep.subr.mxu1 %v214_v28 }
  0x5a   :  { %571 = vmatpush3.msra.mxu0 %v355_v29  ;;  %609 = vmatpush3.msra.mxu1 %v198_v30 }
  0x5b   :  { %572 = vmatprep.subr.mxu0 %v370_v31  ;;  %610 = vmatprep.subr.mxu1 %v213_v32 }
  0x5c   :  { %573 = vmatpush3.msra.mxu0 %v354_v33  ;;  %611 = vmatpush3.msra.mxu1 %v197_v34 }
  0x5d   :  { %574 = vmatprep.subr.mxu0 %v369_v35  ;;  %612 = vmatprep.subr.mxu1 %v212_v36 }
  0x5e   :  { %575 = vmatpush3.msra.mxu0 %v353_v37  ;;  %613 = vmatpush3.msra.mxu1 %v196_v38 }
  0x5f   :  { %576 = vmatprep.subr.mxu0 %v368_v39  ;;  %614 = vmatprep.subr.mxu1 %v211_v40 }
  0x60   :  { %577 = vmatpush3.msra.mxu0 %v352_v41  ;;  %615 = vmatpush3.msra.mxu1 %v195_v42 }
  0x61   :  { %578 = vmatprep.subr.mxu0 %v367_v43  ;;  %616 = vmatprep.subr.mxu1 %v210_v44  ;;  %v557_v43 = vld [vmem:[%s806_s4] ss:$0 sm:$0xff] }
  0x62   :  { %579 = vmatpush3.msra.mxu0 %v351_v45  ;;  %617 = vmatpush3.msra.mxu1 %v194_v46 }
  0x63   :  { %580 = vmatprep.subr.mxu0 %v366_v47  ;;  %618 = vmatprep.subr.mxu1 %v209_v48 }
  0x64   :  { %581 = vmatpush3.msra.mxu0 %v350_v49  ;;  %619 = vmatpush3.msra.mxu1 %v193_v50 }
  0x65   :  { %582 = vmatprep.subr.mxu0 %v365_v51  ;;  %620 = vmatprep.subr.mxu1 %v208_v52 }
  0x66   :  { %583 = vmatpush3.msra.mxu0 %v349_v53  ;;  %621 = vmatpush3.msra.mxu1 %v192_v54 }
  0x67   :  { %584 = vmatprep.subr.mxu0 %v364_v55  ;;  %622 = vmatprep.subr.mxu1 %v207_v56 }
  0x68   :  { %585 = vmatpush3.msra.mxu0 %v348_v57  ;;  %623 = vmatpush3.msra.mxu1 %v191_v58 }
  0x69   :  { %586 = vmatprep.subr.mxu0 %v363_v59  ;;  %624 = vmatprep.subr.mxu1 %v206_v60 }
  0x6a   :  { %587 = vmatpush3.msra.mxu0 %v347_v61  ;;  %625 = vmatpush3.msra.mxu1 %v190_v62 }
  0x6b   :  { %588 = vmatprep.subr.mxu0 %v362_v63  ;;  %626 = vmatprep.subr.mxu1 %v205_v1 }
  0x6c   :  { %589 = vmatpush3.msra.mxu0 %v346_v2  ;;  %627 = vmatpush3.msra.mxu1 %v189_v3 }
 0x10a   :  { %v174_v14 = vpop.f32.mrf.mxu0  ;;  %v331_v15 = vpop.f32.mrf.mxu1 }
 0x10b   :  { %v175_v0 = vadd.f32 %v174_v14, %v101_v10  ;;  %v332_v16 = vadd.f32 %v331_v15, %v258_v11 }
 0x10c   :  { %v176_v17 = vpop.f32.mrf.mxu0  ;;  %v333_v18 = vpop.f32.mrf.mxu1 }
 0x10d   :  { %v177_v19 = vadd.f32 %v176_v17, %v105_v12  ;;  %v334_v20 = vadd.f32 %v333_v18, %v262_v13  ;;  %v185_v25 = vmax.f32 %v175_v0, 0.0  ;;  %v342_v26 = vmax.f32 %v332_v16, 0.0 }
 0x10e   :  { %v180_v21 = vpop.f32.mrf.mxu0  ;;  %v337_v22 = vpop.f32.mrf.mxu1 }
 0x10f   :  { %v186_v23 = vmax.f32 %v177_v19, 0.0  ;;  %v343_v24 = vmax.f32 %v334_v20, 0.0  ;;  %v181_v27 = vadd.f32 %v180_v21, %v101_v10  ;;  %v338_v28 = vadd.f32 %v337_v22, %v258_v11 }
 0x110   :  { %v182_v29 = vpop.f32.mrf.mxu0  ;;  %v339_v30 = vpop.f32.mrf.mxu1 }
 0x111   :  { %v183_v31 = vadd.f32 %v182_v29, %v105_v12  ;;  %v340_v32 = vadd.f32 %v339_v30, %v262_v13  ;;  %442 = vmatprep.mubr.f32.mxu0 %v343_v24  ;;  %517 = vmatprep.mubr.f32.mxu1 %v186_v23  ;;  %v187_v35 = vmax.f32 %v181_v27, 0.0  ;;  %v344_v36 = vmax.f32 %v338_v28, 0.0 }
 0x112   :  { %443 = vmatmul.mubr.f32.vlgmr.msra.gmra.mxu0 %v342_v26  ;;  %518 = vmatmul.mubr.f32.vlgmr.msra.gmra.mxu1 %v185_v25 }
 0x113   :  { %v188_v33 = vmax.f32 %v183_v31, 0.0  ;;  %v345_v34 = vmax.f32 %v340_v32, 0.0 }
 0x115   :  { %447 = vmatprep.mubr.f32.mxu0 %v345_v34  ;;  %522 = vmatprep.mubr.f32.mxu1 %v188_v33 }
 0x116   :  { %448 = vmatmul.mubr.f32.gmra.mxu0 %v344_v36  ;;  %523 = vmatmul.mubr.f32.gmra.mxu1 %v187_v35 }
 0x1d2   :  { %v590_v37 = vpop.f32.mrf.mxu0  ;;  %v628_v38 = vpop.f32.mrf.mxu1 }
 0x1d4   :  { %v591_v39 = vpop.f32.mrf.mxu0  ;;  %v629_v40 = vpop.f32.mrf.mxu1 }
 0x1d5   :  { %v592_v41 = vadd.f32 %v591_v39, %v590_v37  ;;  %v630_v42 = vadd.f32 %v629_v40, %v628_v38 }
 0x1d6   :  { %v593_v44 = vpop.f32.mrf.mxu0  ;;  %v631_v45 = vpop.f32.mrf.mxu1 }
 0x1d7   :  { %v520_v46 = vadd.f32 %v630_v42, %v592_v41 }
 0x1d8   :  { %v594_v47 = vpop.f32.mrf.mxu0  ;;  %v632_v48 = vpop.f32.mrf.mxu1 }
 0x1d9   :  { %v535_v49 = vadd.f32 %v557_v43, %v520_v46  ;;  %v595_v50 = vadd.f32 %v594_v47, %v593_v44  ;;  %v633_v51 = vadd.f32 %v632_v48, %v631_v45 }
 0x1db   :  { %537 = vst [vmem:[#allocation8] sm:$0xff] %v535_v49  ;;  %v525_v52 = vadd.f32 %v633_v51, %v595_v50 }
 0x1dd   :  { %v536_v53 = vadd.f32 %v557_v43, %v525_v52 }
 0x1df   :  { %538 = vst [vmem:[#allocation8 + $0x8] sm:$0xff] %v536_v53 }
 0x1e0   :  { %714 = shalt.err (!%p711_p5)
}
 0x1e1   :  { %550 = dma.vmem_to_hbm [thread:$0]  %s545_s15, 256, %s807_s5, [#allocation4], %s733_s28, %s733_s28, %s734_s29  }
 0x1e2   :  { %727 = dma.done.wait [#allocation4], 256  }
 0x1e3   :  { %728 = vsyncadd [#allocation4], 4294967040 }
 0x1e4   :  { %554 = vsyncpa [#allocation3], 1 }
 0x1e5   :  { %555 = vsyncpa [#allocation6], 1 }
 0x1e6   :  { %556 = vsyncpa [#allocation4], 1 }

</bundles_post_ra>
